<compile_context>
chip_gen: v5e
topology: v5e:2x2
jax: 0.10.0
libtpu: 0.0.40
codegen_flags: <defaults>
</compile_context>

<pallas_src>
import jax
import jax.numpy as jnp
from jax import lax
from jax.experimental import pallas as pl
from jax.experimental.pallas import tpu as pltpu


def _conv_stack_kernel(x_ref, w0_ref, b0_ref, w1_ref, b1_ref, w2_ref, b2_ref,
                       out_ref):
    f32, bf16 = jnp.float32, jnp.bfloat16

    # Streamed activations: single f32 HBM pass, cast to bf16 for the MXU
    # in-kernel (the VPU cast is free relative to the DMA).
    x = x_ref[...].astype(bf16)                                   # (Bblk, 650)

    # conv0 (+bias, ReLU): banded bf16 matmul, f32 accumulation.
    a0 = jnp.dot(x, w0_ref[...], preferred_element_type=f32) + b0_ref[...]
    a0 = jnp.maximum(a0, 0.0).astype(bf16)                        # (Bblk, 128)

    # conv1 (stride 3 folded into the band) (+bias, ReLU).
    # TODO(synk): self.dropout_layer2 is referenced in forward() but never
    # defined in __init__ of the PyTorch module; treated as identity (eval).
    a1 = jnp.dot(a0, w1_ref[...], preferred_element_type=f32) + b1_ref[...]
    a1 = jnp.maximum(a1, 0.0).astype(bf16)                        # (Bblk, 128)

    # conv2 (+bias) -> logits; the "flatten" is already (Bblk, 5); softmax
    # over the class (lane) axis per sample row.
    logits = jnp.dot(a1, w2_ref[...], preferred_element_type=f32) + b2_ref[...]
    m = jnp.max(logits, axis=1, keepdims=True)
    e = jnp.exp(logits - m)
    denom = jnp.sum(e, axis=1, keepdims=True)
    out_ref[...] = e * pl.reciprocal(denom, approx=True)          # (Bblk, 5)


def _band_conv0(w, in_w):
    """conv0 as a banded matrix over input rows flattened in (c, f, t) order.

    w: (O, C, F, KT); returns (out_w*O, C*F*in_w) with row order (pos, out_ch).
    """
    O, C, F, KT = w.shape
    out_w = in_w - KT + 1
    m = jnp.zeros((out_w, O, C, F, in_w), jnp.float32)
    for p in range(out_w):                      # tiny static loop, traced once
        m = m.at[p, :, :, :, p:p + KT].set(w)
    return m.reshape(out_w * O, C * F * in_w), out_w


def _band_conv1d(w, in_w, stride):
    """1-high conv as a banded matrix over rows flattened in (pos, ch) order.

    w: (O, Cin, 1, KT); returns (out_w*O, in_w*Cin) with row order (pos, out_ch).
    """
    O, Cin, KH, KT = w.shape
    assert KH == 1
    out_w = (in_w - KT) // stride + 1
    wt = jnp.transpose(w[:, :, 0, :], (0, 2, 1))                  # (O, KT, Cin)
    m = jnp.zeros((out_w, O, in_w, Cin), jnp.float32)
    for q in range(out_w):
        m = m.at[q, :, q * stride:q * stride + KT, :].set(wt)
    return m.reshape(out_w * O, in_w * Cin), out_w


def _pick_batch_blocking(B, block_b):
    """>=2 blocks (v7x megacore), block a multiple of 8 (sublane axis), and
    prefer a split with zero batch padding (padding costs an extra HBM copy
    of the input)."""
    n_min = max(2, pl.cdiv(B, block_b))
    for n in range(n_min, n_min + 8):           # look for a pad-free split
        blk = B // n
        if blk > 0 and n * blk == B and blk % 8 == 0 and blk <= block_b:
            return blk, B
    # Fall back to padding (only for batch sizes with no clean >=2-way split;
    # the zero rows run bias-only math and are sliced off in the wrapper).
    blk = min(block_b, 8 * pl.cdiv(pl.cdiv(B, n_min), 8))
    return blk, n_min * blk


def conv_net_experimental_forward(x, params, *, block_b=1024):
    """x: (B, C, F, T) float32 (NCHW, like the PyTorch module) -> (B, 5) softmax."""
    assert block_b % 8 == 0
    w0, b0, w1, b1, w2, b2 = params
    B, C, F, T = x.shape
    O0, _, KH0, _ = w0.shape
    O1, O2 = w1.shape[0], w2.shape[0]
    assert KH0 == F and w1.shape[2] == 1 and w2.shape[2] == 1

    f32, bf16 = jnp.float32, jnp.bfloat16

    # Conv stack -> banded matmul weights (transposed for (batch, feature)
    # activations) padded to multiples of 128 on the activation widths.
    m0, w0_out = _band_conv0(w0, T)                               # (124, 650)
    m1, w1_out = _band_conv1d(w1, w0_out, 3)                      # ( 72, 124)
    m2, w2_out = _band_conv1d(w2, w1_out, 1)                      # (  5,  72)
    assert w2_out == 1
    n_out = O2 * w2_out
    n0, n1 = w0_out * O0, w1_out * O1
    n0p = 128 * pl.cdiv(n0, 128)                                  # 124 -> 128
    n1p = 128 * pl.cdiv(n1, 128)                                  #  72 -> 128
    rows = C * F * T

    # Weights resident in VMEM for the whole grid -> pre-cast to bf16 here.
    w0t = jnp.pad(m0, ((0, n0p - n0), (0, 0))).T.astype(bf16)         # (650,128)
    w1t = jnp.pad(m1, ((0, n1p - n1), (0, n0p - n0))).T.astype(bf16)  # (128,128)
    w2t = jnp.pad(m2, ((0, 0), (0, n1p - n1))).T.astype(bf16)         # (128,  5)
    b0p = jnp.pad(jnp.tile(b0, w0_out), (0, n0p - n0)).reshape(1, n0p).astype(f32)
    b1p = jnp.pad(jnp.tile(b1, w1_out), (0, n1p - n1)).reshape(1, n1p).astype(f32)
    b2p = jnp.tile(b2, w2_out).reshape(1, n_out).astype(f32)

    # Natural NCHW row order: (B, C*F*T) is a free reshape, so the kernel's
    # DMA is the only HBM pass over the input (no transpose, no wrapper cast).
    xr = x.reshape(B, rows).astype(f32)

    bblk, b_pad = _pick_batch_blocking(B, block_b)
    if b_pad != B:
        xr = jnp.pad(xr, ((0, b_pad - B), (0, 0)))
    grid = (b_pad // bblk,)

    out = pl.pallas_call(
        _conv_stack_kernel,
        out_shape=jax.ShapeDtypeStruct((b_pad, n_out), jnp.float32),
        grid=grid,
        in_specs=[
            # Input block: lanes = all 650 feature columns (full-dim block, so
            # no K-axis padding copy is needed), sublanes = batch.  On v5e, if
            # profiling shows exposed input DMA, add pipeline_mode=
            # pl.Buffered(3) here (+~1 input-block of VMEM).
            pl.BlockSpec((bblk, rows), lambda i: (i, 0)),
            pl.BlockSpec(w0t.shape, lambda i: (0, 0)),   # banded conv0 (bf16)
            pl.BlockSpec(b0p.shape, lambda i: (0, 0)),
            pl.BlockSpec(w1t.shape, lambda i: (0, 0)),   # banded conv1 (bf16)
            pl.BlockSpec(b1p.shape, lambda i: (0, 0)),
            pl.BlockSpec(w2t.shape, lambda i: (0, 0)),   # banded conv2 (bf16)
            pl.BlockSpec(b2p.shape, lambda i: (0, 0)),
        ],
        out_specs=pl.BlockSpec((bblk, n_out), lambda i: (i, 0)),
        compiler_params=pltpu.CompilerParams(dimension_semantics=("parallel",)),
    )(xr, w0t, b0p, w1t, b1p, w2t, b2p)

    return out[:B]                                                 # (B, n_out)


def _conv_ref(x, params, cast):
    w0, b0, w1, b1, w2, b2 = params
    dn = ('NCHW', 'OIHW', 'NCHW')
    hp = lax.Precision.HIGHEST
    y = lax.conv_general_dilated(cast(x), cast(w0), (1, 1), 'VALID',
                                 dimension_numbers=dn, precision=hp)
    y = jnp.maximum(y + b0[None, :, None, None], 0.0)
    y = lax.conv_general_dilated(cast(y), cast(w1), (1, 3), 'VALID',
                                 dimension_numbers=dn, precision=hp)
    y = jnp.maximum(y + b1[None, :, None, None], 0.0)
    y = lax.conv_general_dilated(cast(y), cast(w2), (1, 1), 'VALID',
                                 dimension_numbers=dn, precision=hp)
    y = (y + b2[None, :, None, None]).reshape(y.shape[0], -1)
    return jax.nn.softmax(y, axis=1)


def forward_ref(x, params):
    """Pure-JAX f32 reference matching the PyTorch forward exactly."""
    return _conv_ref(x, params, lambda a: a)


def forward_ref_mixed(x, params):
    """Reference mirroring the kernel's precision: bf16 operands, f32 accum."""
    bf = lambda a: a.astype(jnp.bfloat16).astype(jnp.float32)
    return _conv_ref(x, params, bf)


if __name__ == "__main__":
    n_classes = 5
    data_size = (1, 13, 50)            # (n_channels, n_features, n_frames)
    C, F, T = data_size

    key = jax.random.PRNGKey(0)
    kx, k0, k1, k2, k3, k4, k5 = jax.random.split(key, 7)

    # Deterministic synthetic parameters (same shapes as the PyTorch Conv2d layers).
    params = (
        0.1 * jax.random.normal(k0, (4, C, F, 20), jnp.float32),   # conv0 weight
        0.1 * jax.random.normal(k1, (4,), jnp.float32),            # conv0 bias
        0.1 * jax.random.normal(k2, (8, 4, 1, 6), jnp.float32),    # conv1 weight
        0.1 * jax.random.normal(k3, (8,), jnp.float32),            # conv1 bias
        0.1 * jax.random.normal(k4, (5, 8, 1, 9), jnp.float32),    # conv2 weight
        0.1 * jax.random.normal(k5, (5,), jnp.float32),            # conv2 bias
    )

    fwd = jax.jit(lambda xx: conv_net_experimental_forward(xx, params))

    # B=2: small-batch path (2 padded blocks of 8 -> both v7x cores busy).
    # B=520: multi-block, pad-free path (5 blocks of 104 samples).
    for B in (2, 520):
        xb = jax.random.normal(kx, (B, C, F, T), jnp.float32)
        out = jax.block_until_ready(fwd(xb))
        assert out.shape == (B, n_classes), out.shape

        # Tight check vs a reference that uses the kernel's precision (bf16
        # operands, f32 accumulation): validates the banded-matmul math.
        ref_mx = forward_ref_mixed(xb, params)
        assert bool(jnp.allclose(out, ref_mx, atol=5e-3, rtol=5e-3)), (
            B, float(jnp.max(jnp.abs(out - ref_mx))))

        # Looser check vs the exact f32 (PyTorch-semantics) reference: bounds
        # the bf16 quantization error of the fast path.
        ref_fp = forward_ref(xb, params)
        assert bool(jnp.allclose(out, ref_fp, atol=5e-2, rtol=5e-2)), (
            B, float(jnp.max(jnp.abs(out - ref_fp))))

    print("KERNEL_OK")
</pallas_src>

<mosaic_0001>
module attributes {stable_mosaic.version = 11 : i64} {
  func.func @_conv_stack_kernel(%arg0: i32, %arg1: memref<8x650xf32, #tpu.memory_space<vmem>>, %arg2: memref<650x128xbf16, #tpu.memory_space<vmem>>, %arg3: memref<1x128xf32, #tpu.memory_space<vmem>>, %arg4: memref<128x128xbf16, #tpu.memory_space<vmem>>, %arg5: memref<1x128xf32, #tpu.memory_space<vmem>>, %arg6: memref<128x5xbf16, #tpu.memory_space<vmem>>, %arg7: memref<1x5xf32, #tpu.memory_space<vmem>>, %arg8: memref<8x5xf32, #tpu.memory_space<vmem>>) attributes {dimension_semantics = [#tpu.dimension_semantics<parallel>], iteration_bounds = array<i64: 2>, scalar_prefetch = 0 : i64, scratch_operands = 0 : i64, tpu.core_type = #tpu.core_type<tc>, window_params = [{transform_indices = @transform_0, window_bounds = array<i64: 8, 650>}, {pipeline_mode = #tpu.pipeline_mode<synchronous>, transform_indices = @transform_1, window_bounds = array<i64: 650, 128>}, {pipeline_mode = #tpu.pipeline_mode<synchronous>, transform_indices = @transform_2, window_bounds = array<i64: 1, 128>}, {pipeline_mode = #tpu.pipeline_mode<synchronous>, transform_indices = @transform_3, window_bounds = array<i64: 128, 128>}, {pipeline_mode = #tpu.pipeline_mode<synchronous>, transform_indices = @transform_4, window_bounds = array<i64: 1, 128>}, {pipeline_mode = #tpu.pipeline_mode<synchronous>, transform_indices = @transform_5, window_bounds = array<i64: 128, 5>}, {pipeline_mode = #tpu.pipeline_mode<synchronous>, transform_indices = @transform_6, window_bounds = array<i64: 1, 5>}, {transform_indices = @transform_7, window_bounds = array<i64: 8, 5>}]} {
    %c0 = arith.constant 0 : index
    %c0_0 = arith.constant 0 : index
    %0 = vector.load %arg1[%c0, %c0_0] : memref<8x650xf32, #tpu.memory_space<vmem>>, vector<8x650xf32>
    %1 = arith.truncf %0 : vector<8x650xf32> to vector<8x650xbf16>
    %c0_1 = arith.constant 0 : index
    %c0_2 = arith.constant 0 : index
    %2 = vector.load %arg2[%c0_1, %c0_2] : memref<650x128xbf16, #tpu.memory_space<vmem>>, vector<650x128xbf16>
    %cst = arith.constant dense<0.000000e+00> : vector<8x128xf32>
    %3 = tpu.matmul %1, %2, %cst {dimension_numbers = #tpu.dot_dimension_numbers<[1], [0], [0], [1], [0, 0, 1, 1], [], []>} : vector<8x650xbf16>, vector<650x128xbf16>, vector<8x128xf32> -> vector<8x128xf32>
    %c0_3 = arith.constant 0 : index
    %c0_4 = arith.constant 0 : index
    %4 = vector.load %arg3[%c0_3, %c0_4] : memref<1x128xf32, #tpu.memory_space<vmem>>, vector<1x128xf32>
    %5 = vector.broadcast %4 : vector<1x128xf32> to vector<8x128xf32>
    %6 = arith.addf %3, %5 : vector<8x128xf32>
    %cst_5 = arith.constant 0.000000e+00 : f32
    %7 = vector.broadcast %cst_5 : f32 to vector<8x128xf32>
    %8 = arith.maximumf %6, %7 : vector<8x128xf32>
    %9 = arith.truncf %8 : vector<8x128xf32> to vector<8x128xbf16>
    %c0_6 = arith.constant 0 : index
    %c0_7 = arith.constant 0 : index
    %10 = vector.load %arg4[%c0_6, %c0_7] : memref<128x128xbf16, #tpu.memory_space<vmem>>, vector<128x128xbf16>
    %cst_8 = arith.constant dense<0.000000e+00> : vector<8x128xf32>
    %11 = tpu.matmul %9, %10, %cst_8 {dimension_numbers = #tpu.dot_dimension_numbers<[1], [0], [0], [1], [0, 0, 1, 1], [], []>} : vector<8x128xbf16>, vector<128x128xbf16>, vector<8x128xf32> -> vector<8x128xf32>
    %c0_9 = arith.constant 0 : index
    %c0_10 = arith.constant 0 : index
    %12 = vector.load %arg5[%c0_9, %c0_10] : memref<1x128xf32, #tpu.memory_space<vmem>>, vector<1x128xf32>
    %13 = vector.broadcast %12 : vector<1x128xf32> to vector<8x128xf32>
    %14 = arith.addf %11, %13 : vector<8x128xf32>
    %cst_11 = arith.constant 0.000000e+00 : f32
    %15 = vector.broadcast %cst_11 : f32 to vector<8x128xf32>
    %16 = arith.maximumf %14, %15 : vector<8x128xf32>
    %17 = arith.truncf %16 : vector<8x128xf32> to vector<8x128xbf16>
    %c0_12 = arith.constant 0 : index
    %c0_13 = arith.constant 0 : index
    %18 = vector.load %arg6[%c0_12, %c0_13] : memref<128x5xbf16, #tpu.memory_space<vmem>>, vector<128x5xbf16>
    %cst_14 = arith.constant dense<0.000000e+00> : vector<8x5xf32>
    %19 = tpu.matmul %17, %18, %cst_14 {dimension_numbers = #tpu.dot_dimension_numbers<[1], [0], [0], [1], [0, 0, 1, 1], [], []>} : vector<8x128xbf16>, vector<128x5xbf16>, vector<8x5xf32> -> vector<8x5xf32>
    %c0_15 = arith.constant 0 : index
    %c0_16 = arith.constant 0 : index
    %20 = vector.load %arg7[%c0_15, %c0_16] : memref<1x5xf32, #tpu.memory_space<vmem>>, vector<1x5xf32>
    %21 = vector.broadcast %20 : vector<1x5xf32> to vector<8x5xf32>
    %22 = arith.addf %19, %21 : vector<8x5xf32>
    %cst_17 = arith.constant dense<0xFF800000> : vector<8xf32>
    %23 = vector.multi_reduction <maximumf>, %22, %cst_17 [1] : vector<8x5xf32> to vector<8xf32>
    %24 = vector.shape_cast %23 : vector<8xf32> to vector<8x1xf32>
    %25 = vector.broadcast %24 : vector<8x1xf32> to vector<8x5xf32>
    %26 = arith.subf %22, %25 : vector<8x5xf32>
    %27 = math.exp %26 : vector<8x5xf32>
    %cst_18 = arith.constant dense<0.000000e+00> : vector<8xf32>
    %28 = vector.multi_reduction <add>, %27, %cst_18 [1] : vector<8x5xf32> to vector<8xf32>
    %29 = vector.shape_cast %28 : vector<8xf32> to vector<8x1xf32>
    %30 = tpu.reciprocal %29 {approx = true} : vector<8x1xf32> -> vector<8x1xf32>
    %31 = vector.broadcast %30 : vector<8x1xf32> to vector<8x5xf32>
    %32 = arith.mulf %27, %31 : vector<8x5xf32>
    %c0_19 = arith.constant 0 : index
    %c0_20 = arith.constant 0 : index
    %33 = vector.load %arg8[%c0_19, %c0_20] : memref<8x5xf32, #tpu.memory_space<vmem>>, vector<8x5xf32>
    tpu.vector_store %arg8[%c0_19, %c0_20], %32 {strides = array<i32>} : memref<8x5xf32, #tpu.memory_space<vmem>>, vector<8x5xf32>,
    return
  }
  func.func @transform_0(%arg0: i32) -> (i32, i32) {
    %c0_i32 = arith.constant 0 : i32
    %c0_i32_0 = arith.constant 0 : i32
    return %arg0, %c0_i32 : i32, i32
  }
  func.func @transform_1(%arg0: i32) -> (i32, i32) {
    %c0_i32 = arith.constant 0 : i32
    %c0_i32_0 = arith.constant 0 : i32
    %c0_i32_1 = arith.constant 0 : i32
    return %c0_i32, %c0_i32_0 : i32, i32
  }
  func.func @transform_2(%arg0: i32) -> (i32, i32) {
    %c0_i32 = arith.constant 0 : i32
    %c0_i32_0 = arith.constant 0 : i32
    %c0_i32_1 = arith.constant 0 : i32
    return %c0_i32, %c0_i32_0 : i32, i32
  }
  func.func @transform_3(%arg0: i32) -> (i32, i32) {
    %c0_i32 = arith.constant 0 : i32
    %c0_i32_0 = arith.constant 0 : i32
    %c0_i32_1 = arith.constant 0 : i32
    return %c0_i32, %c0_i32_0 : i32, i32
  }
  func.func @transform_4(%arg0: i32) -> (i32, i32) {
    %c0_i32 = arith.constant 0 : i32
    %c0_i32_0 = arith.constant 0 : i32
    %c0_i32_1 = arith.constant 0 : i32
    return %c0_i32, %c0_i32_0 : i32, i32
  }
  func.func @transform_5(%arg0: i32) -> (i32, i32) {
    %c0_i32 = arith.constant 0 : i32
    %c0_i32_0 = arith.constant 0 : i32
    %c0_i32_1 = arith.constant 0 : i32
    return %c0_i32, %c0_i32_0 : i32, i32
  }
  func.func @transform_6(%arg0: i32) -> (i32, i32) {
    %c0_i32 = arith.constant 0 : i32
    %c0_i32_0 = arith.constant 0 : i32
    %c0_i32_1 = arith.constant 0 : i32
    return %c0_i32, %c0_i32_0 : i32, i32
  }
  func.func @transform_7(%arg0: i32) -> (i32, i32) {
    %c0_i32 = arith.constant 0 : i32
    %c0_i32_0 = arith.constant 0 : i32
    return %arg0, %c0_i32 : i32, i32
  }
}

</mosaic_0001>

<bundles_post_ra>
// kernel: tile.14
= control target key start
LH: loop header
LB: loop body
LE: loop exit
PB: predicated region body
PF: predicated region fallthrough
CT: control target
= control target key end

     0   :  { %s28_s0 = inlined_call_operand.vmem [shape: f32[8], index: 0, kind: input, shape index: {}]   ;;  %s29_s1 = inlined_call_operand.vmem [shape: f32[9,8], index: 1, kind: output, shape index: {}]  }
   0x1   :  { %v4_v0 = vld [vmem:[%s28_s0] ss:$0 sm:$0xff] }
   0x2   :  { %5 = vst [vmem:[%s29_s1] sm:$0xff] %v4_v0 }
   0x3   :  { %8 = vst [vmem:[%s29_s1 + $0x8] sm:$0xff] %v4_v0 }

// kernel: tile.15
= control target key start
LH: loop header
LB: loop body
LE: loop exit
PB: predicated region body
PF: predicated region fallthrough
CT: control target
= control target key end

     0   :  { %s75_s10 = smov 64   ;;  %s76_s11 = smov 48   ;;  %vm3_vm0 = vcmask 64512   ;;  %vm9_vm1 = vcmask 589312   ;;  %vm15_vm2 = vcmask 523712   ;;  %vm21_vm3 = vcmask 458112   ;;  %s123_s0 = inlined_call_operand.vmem [shape: f32[9,8], index: 0, kind: input, shape index: {}]   ;;  %s124_s1 = inlined_call_operand.vmem [shape: f32[72], index: 1, kind: output, shape index: {}]  }
   0x1   :  { %v59_v0 = vld [vmem:[%s123_s0 + $0x8] sm:$0x1]   ;;  %v61_v1 = vld [vmem:[%s123_s0 + $0x6] sm:$0x1]   ;;  %v63_v2 = vld [vmem:[%s123_s0 + $0x4] sm:$0x1]  }
   0x2   :  { %7 = vrot.lane.b32.xlu0 %v59_v0, %s75_s10  ;;  %19 = vrot.lane.b32.xlu1 %v61_v1, %s76_s11  ;;  %s77_s14 = smov 32   ;;  %v60_v3 = vld [vmem:[%s123_s0 + $0x7] sm:$0x1]   ;;  %v62_v4 = vld [vmem:[%s123_s0 + $0x5] sm:$0x1]   ;;  %s78_s19 = smov 56  }
   0x3   :  { %31 = vrot.lane.b32.xlu2 %v63_v2, %s77_s14  ;;  %s79_s20 = smov 40   ;;  %v64_v5 = vld [vmem:[%s123_s0 + $0x3] sm:$0x1]   ;;  %s80_s23 = smov 24   ;;  %v65_v6 = vld [vmem:[%s123_s0 + $0x2] sm:$0x1]  }
   0x4   :  { %v66_v7 = vld [vmem:[%s123_s0 + $0x1] sm:$0x1]   ;;  %s81_s28 = smov 16   ;;  %s82_s29 = smov 8   ;;  %v2_v8 = vld [vmem:[%s123_s0] sm:$0x1]  }
   0x5   :  { %4 = vst.msk [vmem:[#allocation0] sm:$0x1] %vm3_vm0, %v2_v8   ;;  %vm27_vm4 = vcmask 392512   ;;  %vm33_vm5 = vcmask 326912   ;;  %vm39_vm6 = vcmask 261312   ;;  %vm45_vm7 = vcmask 195712  }
   0x6   :  { %vm51_vm8 = vcmask 130112  }
   0xa   :  { %13 = vrot.lane.b32.xlu0 %v60_v3, %s78_s19  ;;  %25 = vrot.lane.b32.xlu1 %v62_v4, %s79_s20 }
   0xb   :  { %37 = vrot.lane.b32.xlu2 %v64_v5, %s80_s23 }
  0x12   :  { %43 = vrot.lane.b32.xlu0 %v65_v6, %s81_s28  ;;  %49 = vrot.lane.b32.xlu1 %v66_v7, %s82_s29 }
  0x5d   :  { %v32_v9 = vpop.permute.xlu2 %31  }
  0x65   :  { %v38_v10 = vpop.permute.xlu2 %37  }
  0x74   :  { %v8_v11 = vpop.permute.xlu0 %7   ;;  %v20_v12 = vpop.permute.xlu1 %19  }
  0x75   :  { %10 = vst.msk [vmem:[#allocation0] sm:$0x1] %vm9_vm1, %v8_v11  }
  0x7c   :  { %v14_v13 = vpop.permute.xlu0 %13   ;;  %v26_v14 = vpop.permute.xlu1 %25  }
  0x7d   :  { %16 = vst.msk [vmem:[#allocation0] sm:$0x1] %vm15_vm2, %v14_v13  }
  0x7e   :  { %22 = vst.msk [vmem:[#allocation0] sm:$0x1] %vm21_vm3, %v20_v12  }
  0x7f   :  { %28 = vst.msk [vmem:[#allocation0] sm:$0x1] %vm27_vm4, %v26_v14  }
  0x80   :  { %34 = vst.msk [vmem:[#allocation0] sm:$0x1] %vm33_vm5, %v32_v9  }
  0x81   :  { %40 = vst.msk [vmem:[#allocation0] sm:$0x1] %vm39_vm6, %v38_v10  }
  0x84   :  { %v44_v15 = vpop.permute.xlu0 %43   ;;  %v50_v16 = vpop.permute.xlu1 %49  }
  0x85   :  { %46 = vst.msk [vmem:[#allocation0] sm:$0x1] %vm45_vm7, %v44_v15  }
  0x86   :  { %52 = vst.msk [vmem:[#allocation0] sm:$0x1] %vm51_vm8, %v50_v16  }
  0x8d   :  { %v55_v17 = vld [vmem:[#allocation0] sm:$0x1] }
  0x8e   :  { %58 = vst [vmem:[%s124_s1] sm:$0x1] %v55_v17 }

// kernel: tile.10
= control target key start
LH: loop header
LB: loop body
LE: loop exit
PB: predicated region body
PF: predicated region fallthrough
CT: control target
= control target key end

     0   :  { %s40_s0 = inlined_call_operand.vmem [shape: f32[4], index: 0, kind: input, shape index: {}]   ;;  %s41_s1 = inlined_call_operand.vmem [shape: f32[31,4], index: 1, kind: output, shape index: {}]  }
   0x1   :  { %v4_v0 = vld [vmem:[%s40_s0] ss:$0 sm:$0xff] }
   0x2   :  { %5 = vst [vmem:[%s41_s1] sm:$0xff] %v4_v0 }
   0x3   :  { %12 = vst [vmem:[%s41_s1 + $0x8] sm:$0xff] %v4_v0 }
   0x4   :  { %13 = vst [vmem:[%s41_s1 + $0x10] sm:$0xff] %v4_v0 }
   0x5   :  { %14 = vst [vmem:[%s41_s1 + $0x18] sm:$0xff] %v4_v0 }

// kernel: tile.11
= control target key start
LH: loop header
LB: loop body
LE: loop exit
PB: predicated region body
PF: predicated region fallthrough
CT: control target
= control target key end

     0   :  { %s251_s10 = smov 120   ;;  %s252_s11 = smov 112   ;;  %vm3_vm0 = vcmask 31744   ;;  %vm9_vm1 = vcmask 1015744   ;;  %vm15_vm2 = vcmask 982944   ;;  %vm21_vm3 = vcmask 950144   ;;  %s387_s0 = inlined_call_operand.vmem [shape: f32[31,4], index: 0, kind: input, shape index: {}]   ;;  %s388_s1 = inlined_call_operand.vmem [shape: f32[124], index: 1, kind: output, shape index: {}]  }
   0x1   :  { %v191_v0 = vld [vmem:[%s387_s0 + $0x1e] sm:$0x1]   ;;  %v193_v1 = vld [vmem:[%s387_s0 + $0x1c] sm:$0x1]   ;;  %v195_v2 = vld [vmem:[%s387_s0 + $0x1a] sm:$0x1]  }
   0x2   :  { %7 = vrot.lane.b32.xlu0 %v191_v0, %s251_s10  ;;  %19 = vrot.lane.b32.xlu1 %v193_v1, %s252_s11  ;;  %s253_s14 = smov 104   ;;  %v192_v3 = vld [vmem:[%s387_s0 + $0x1d] sm:$0x1]   ;;  %v194_v4 = vld [vmem:[%s387_s0 + $0x1b] sm:$0x1]   ;;  %s254_s19 = smov 116  }
   0x3   :  { %31 = vrot.lane.b32.xlu2 %v195_v2, %s253_s14  ;;  %s255_s20 = smov 108   ;;  %v196_v5 = vld [vmem:[%s387_s0 + $0x19] sm:$0x1]   ;;  %s256_s23 = smov 100   ;;  %v197_v6 = vld [vmem:[%s387_s0 + $0x18] sm:$0x1]  }
   0x4   :  { %v198_v7 = vld [vmem:[%s387_s0 + $0x17] sm:$0x1]   ;;  %s257_s28 = smov 96   ;;  %s258_s29 = smov 92   ;;  %v199_v8 = vld [vmem:[%s387_s0 + $0x16] sm:$0x1]  }
   0x5   :  { %s259_s3 = smov 88   ;;  %v200_v9 = vld [vmem:[%s387_s0 + $0x15] sm:$0x1]   ;;  %v201_v10 = vld [vmem:[%s387_s0 + $0x14] sm:$0x1]   ;;  %s260_s8 = smov 84  }
   0x6   :  { %s261_s9 = smov 80   ;;  %v202_v11 = vld [vmem:[%s387_s0 + $0x13] sm:$0x1]   ;;  %s262_s12 = smov 76   ;;  %v203_v12 = vld [vmem:[%s387_s0 + $0x12] sm:$0x1]  }
   0x7   :  { %v204_v13 = vld [vmem:[%s387_s0 + $0x11] sm:$0x1]   ;;  %s263_s17 = smov 72   ;;  %s264_s18 = smov 68   ;;  %v205_v14 = vld [vmem:[%s387_s0 + $0x10] sm:$0x1]  }
   0x8   :  { %s265_s21 = smov 64   ;;  %v206_v15 = vld [vmem:[%s387_s0 + $0xf] sm:$0x1]   ;;  %v207_v16 = vld [vmem:[%s387_s0 + $0xe] sm:$0x1]   ;;  %s266_s26 = smov 60  }
   0x9   :  { %s267_s27 = smov 56   ;;  %v208_v17 = vld [vmem:[%s387_s0 + $0xd] sm:$0x1]   ;;  %s268_s30 = smov 52   ;;  %v209_v18 = vld [vmem:[%s387_s0 + $0xc] sm:$0x1]  }
   0xa   :  { %13 = vrot.lane.b32.xlu0 %v192_v3, %s254_s19  ;;  %25 = vrot.lane.b32.xlu1 %v194_v4, %s255_s20  ;;  %v210_v19 = vld [vmem:[%s387_s0 + $0xb] sm:$0x1]   ;;  %s269_s6 = smov 48   ;;  %s270_s7 = smov 44   ;;  %v211_v20 = vld [vmem:[%s387_s0 + $0xa] sm:$0x1]  }
   0xb   :  { %37 = vrot.lane.b32.xlu2 %v196_v5, %s256_s23  ;;  %s271_s10 = smov 40   ;;  %v212_v21 = vld [vmem:[%s387_s0 + $0x9] sm:$0x1]   ;;  %v213_v22 = vld [vmem:[%s387_s0 + $0x8] sm:$0x1]   ;;  %s272_s15 = smov 36  }
   0xc   :  { %s273_s16 = smov 32   ;;  %v214_v23 = vld [vmem:[%s387_s0 + $0x7] sm:$0x1]   ;;  %s274_s19 = smov 28   ;;  %v215_v24 = vld [vmem:[%s387_s0 + $0x6] sm:$0x1]  }
   0xd   :  { %v216_v25 = vld [vmem:[%s387_s0 + $0x5] sm:$0x1]   ;;  %s275_s24 = smov 24   ;;  %s276_s25 = smov 20   ;;  %v217_v26 = vld [vmem:[%s387_s0 + $0x4] sm:$0x1]  }
   0xe   :  { %v218_v27 = vld [vmem:[%s387_s0 + $0x3] sm:$0x1]   ;;  %v219_v28 = vld [vmem:[%s387_s0 + $0x2] sm:$0x1]   ;;  %s278_s4 = smov 12   ;;  %s279_s5 = smov 8  }
   0xf   :  { %v220_v29 = vld [vmem:[%s387_s0 + $0x1] sm:$0x1]   ;;  %v2_v30 = vld [vmem:[%s387_s0] sm:$0x1]   ;;  %vm27_vm4 = vcmask 917344   ;;  %vm33_vm5 = vcmask 884544  }
  0x10   :  { %4 = vst.msk [vmem:[#allocation0] sm:$0x1] %vm3_vm0, %v2_v30   ;;  %vm39_vm6 = vcmask 851744   ;;  %vm45_vm7 = vcmask 818944   ;;  %vm51_vm8 = vcmask 786144   ;;  %vm57_vm9 = vcmask 753344  }
  0x11   :  { %vm63_vm10 = vcmask 720544   ;;  %vm69_vm11 = vcmask 687744   ;;  %vm75_vm12 = vcmask 654944   ;;  %vm81_vm13 = vcmask 622144  }
  0x12   :  { %43 = vrot.lane.b32.xlu0 %v197_v6, %s257_s28  ;;  %49 = vrot.lane.b32.xlu1 %v198_v7, %s258_s29  ;;  %s277_s28 = smov 16   ;;  %vm87_vm14 = vcmask 589344   ;;  %vm93_vm15 = vcmask 556544   ;;  %vm99_vm0 = vcmask 523744  }
  0x13   :  { %55 = vrot.lane.b32.xlu2 %v199_v8, %s259_s3 }
  0x1a   :  { %61 = vrot.lane.b32.xlu0 %v200_v9, %s260_s8  ;;  %67 = vrot.lane.b32.xlu1 %v201_v10, %s261_s9  ;;  %s280_s8 = smov 4  }
  0x1b   :  { %73 = vrot.lane.b32.xlu2 %v202_v11, %s262_s12 }
  0x22   :  { %79 = vrot.lane.b32.xlu0 %v203_v12, %s263_s17  ;;  %85 = vrot.lane.b32.xlu1 %v204_v13, %s264_s18 }
  0x23   :  { %91 = vrot.lane.b32.xlu2 %v205_v14, %s265_s21 }
  0x2a   :  { %97 = vrot.lane.b32.xlu0 %v206_v15, %s266_s26  ;;  %103 = vrot.lane.b32.xlu1 %v207_v16, %s267_s27 }
  0x2b   :  { %109 = vrot.lane.b32.xlu2 %v208_v17, %s268_s30 }
  0x32   :  { %115 = vrot.lane.b32.xlu0 %v209_v18, %s269_s6  ;;  %121 = vrot.lane.b32.xlu1 %v210_v19, %s270_s7 }
  0x33   :  { %127 = vrot.lane.b32.xlu2 %v211_v20, %s271_s10 }
  0x3a   :  { %133 = vrot.lane.b32.xlu0 %v212_v21, %s272_s15  ;;  %139 = vrot.lane.b32.xlu1 %v213_v22, %s273_s16 }
  0x3b   :  { %145 = vrot.lane.b32.xlu2 %v214_v23, %s274_s19 }
  0x42   :  { %151 = vrot.lane.b32.xlu0 %v215_v24, %s275_s24  ;;  %157 = vrot.lane.b32.xlu1 %v216_v25, %s276_s25 }
  0x43   :  { %163 = vrot.lane.b32.xlu2 %v217_v26, %s277_s28 }
  0x4a   :  { %169 = vrot.lane.b32.xlu0 %v218_v27, %s278_s4  ;;  %175 = vrot.lane.b32.xlu1 %v219_v28, %s279_s5 }
  0x4b   :  { %181 = vrot.lane.b32.xlu2 %v220_v29, %s280_s8 }
  0x5d   :  { %v32_v31 = vpop.permute.xlu2 %31  }
  0x65   :  { %v38_v32 = vpop.permute.xlu2 %37  }
  0x6d   :  { %v56_v33 = vpop.permute.xlu2 %55  }
  0x74   :  { %v8_v34 = vpop.permute.xlu0 %7   ;;  %v20_v35 = vpop.permute.xlu1 %19  }
  0x75   :  { %10 = vst.msk [vmem:[#allocation0] sm:$0x1] %vm9_vm1, %v8_v34   ;;  %v74_v36 = vpop.permute.xlu2 %73   ;;  %vm105_vm1 = vcmask 490944  }
  0x7c   :  { %v14_v37 = vpop.permute.xlu0 %13   ;;  %v26_v38 = vpop.permute.xlu1 %25  }
  0x7d   :  { %16 = vst.msk [vmem:[#allocation0] sm:$0x1] %vm15_vm2, %v14_v37   ;;  %v92_v39 = vpop.permute.xlu2 %91   ;;  %vm111_vm2 = vcmask 458144  }
  0x7e   :  { %22 = vst.msk [vmem:[#allocation0] sm:$0x1] %vm21_vm3, %v20_v35   ;;  %vm117_vm3 = vcmask 425344  }
  0x7f   :  { %28 = vst.msk [vmem:[#allocation0] sm:$0x1] %vm27_vm4, %v26_v38   ;;  %vm123_vm4 = vcmask 392544  }
  0x80   :  { %34 = vst.msk [vmem:[#allocation0] sm:$0x1] %vm33_vm5, %v32_v31   ;;  %vm129_vm5 = vcmask 359744  }
  0x81   :  { %40 = vst.msk [vmem:[#allocation0] sm:$0x1] %vm39_vm6, %v38_v32   ;;  %vm135_vm6 = vcmask 326944  }
  0x84   :  { %v44_v40 = vpop.permute.xlu0 %43   ;;  %v50_v41 = vpop.permute.xlu1 %49  }
  0x85   :  { %46 = vst.msk [vmem:[#allocation0] sm:$0x1] %vm45_vm7, %v44_v40   ;;  %v110_v42 = vpop.permute.xlu2 %109   ;;  %vm141_vm7 = vcmask 294144  }
  0x86   :  { %52 = vst.msk [vmem:[#allocation0] sm:$0x1] %vm51_vm8, %v50_v41   ;;  %vm147_vm8 = vcmask 261344  }
  0x87   :  { %58 = vst.msk [vmem:[#allocation0] sm:$0x1] %vm57_vm9, %v56_v33   ;;  %vm153_vm9 = vcmask 228544  }
  0x8c   :  { %v62_v43 = vpop.permute.xlu0 %61   ;;  %v68_v44 = vpop.permute.xlu1 %67  }
  0x8d   :  { %64 = vst.msk [vmem:[#allocation0] sm:$0x1] %vm63_vm10, %v62_v43   ;;  %v128_v45 = vpop.permute.xlu2 %127   ;;  %vm159_vm10 = vcmask 195744  }
  0x8e   :  { %70 = vst.msk [vmem:[#allocation0] sm:$0x1] %vm69_vm11, %v68_v44   ;;  %vm165_vm11 = vcmask 162944  }
  0x8f   :  { %76 = vst.msk [vmem:[#allocation0] sm:$0x1] %vm75_vm12, %v74_v36   ;;  %vm171_vm12 = vcmask 130144  }
  0x94   :  { %v80_v46 = vpop.permute.xlu0 %79   ;;  %v86_v47 = vpop.permute.xlu1 %85  }
  0x95   :  { %82 = vst.msk [vmem:[#allocation0] sm:$0x1] %vm81_vm13, %v80_v46   ;;  %v146_v48 = vpop.permute.xlu2 %145   ;;  %vm177_vm13 = vcmask 97344  }
  0x96   :  { %88 = vst.msk [vmem:[#allocation0] sm:$0x1] %vm87_vm14, %v86_v47   ;;  %vm183_vm14 = vcmask 64544  }
  0x97   :  { %94 = vst.msk [vmem:[#allocation0] sm:$0x1] %vm93_vm15, %v92_v39  }
  0x9c   :  { %v98_v49 = vpop.permute.xlu0 %97   ;;  %v104_v50 = vpop.permute.xlu1 %103  }
  0x9d   :  { %100 = vst.msk [vmem:[#allocation0] sm:$0x1] %vm99_vm0, %v98_v49   ;;  %v164_v51 = vpop.permute.xlu2 %163  }
  0x9e   :  { %106 = vst.msk [vmem:[#allocation0] sm:$0x1] %vm105_vm1, %v104_v50  }
  0x9f   :  { %112 = vst.msk [vmem:[#allocation0] sm:$0x1] %vm111_vm2, %v110_v42  }
  0xa4   :  { %v116_v52 = vpop.permute.xlu0 %115   ;;  %v122_v53 = vpop.permute.xlu1 %121  }
  0xa5   :  { %118 = vst.msk [vmem:[#allocation0] sm:$0x1] %vm117_vm3, %v116_v52   ;;  %v182_v54 = vpop.permute.xlu2 %181  }
  0xa6   :  { %124 = vst.msk [vmem:[#allocation0] sm:$0x1] %vm123_vm4, %v122_v53  }
  0xa7   :  { %130 = vst.msk [vmem:[#allocation0] sm:$0x1] %vm129_vm5, %v128_v45  }
  0xac   :  { %v134_v55 = vpop.permute.xlu0 %133   ;;  %v140_v56 = vpop.permute.xlu1 %139  }
  0xad   :  { %136 = vst.msk [vmem:[#allocation0] sm:$0x1] %vm135_vm6, %v134_v55  }
  0xae   :  { %142 = vst.msk [vmem:[#allocation0] sm:$0x1] %vm141_vm7, %v140_v56  }
  0xaf   :  { %148 = vst.msk [vmem:[#allocation0] sm:$0x1] %vm147_vm8, %v146_v48  }
  0xb4   :  { %v152_v57 = vpop.permute.xlu0 %151   ;;  %v158_v58 = vpop.permute.xlu1 %157  }
  0xb5   :  { %154 = vst.msk [vmem:[#allocation0] sm:$0x1] %vm153_vm9, %v152_v57  }
  0xb6   :  { %160 = vst.msk [vmem:[#allocation0] sm:$0x1] %vm159_vm10, %v158_v58  }
  0xb7   :  { %166 = vst.msk [vmem:[#allocation0] sm:$0x1] %vm165_vm11, %v164_v51  }
  0xbc   :  { %v170_v59 = vpop.permute.xlu0 %169   ;;  %v176_v60 = vpop.permute.xlu1 %175  }
  0xbd   :  { %172 = vst.msk [vmem:[#allocation0] sm:$0x1] %vm171_vm12, %v170_v59  }
  0xbe   :  { %178 = vst.msk [vmem:[#allocation0] sm:$0x1] %vm177_vm13, %v176_v60  }
  0xbf   :  { %184 = vst.msk [vmem:[#allocation0] sm:$0x1] %vm183_vm14, %v182_v54  }
  0xc6   :  { %v187_v61 = vld [vmem:[#allocation0] sm:$0x1] }
  0xc7   :  { %190 = vst [vmem:[%s388_s1] sm:$0x1] %v187_v61 }

// kernel: _lambda_.1
= control target key start
LH: loop header
LB: loop body
LE: loop exit
PB: predicated region body
PF: predicated region fallthrough
CT: control target
= control target key end

     0   :  { %12 = vsyncpa [#allocation3], 0  ;;  %s1379_s24 = smov 0   ;;  %s1476_s0 = inlined_call_operand.vmem [shape: f32[16,650], index: 0, kind: input, shape index: {}]   ;;  %s1477_s1 = inlined_call_operand.hbm [shape: bf16[650,128], index: 1, kind: input, shape index: {}]   ;;  %s1478_s2 = inlined_call_operand.vmem [shape: f32[1,128], index: 2, kind: input, shape index: {}]   ;;  %s1479_s3 = inlined_call_operand.vmem [shape: bf16[128,128], index: 3, kind: input, shape index: {}]   ;;  %s1480_s4 = inlined_call_operand.vmem [shape: f32[1,128], index: 4, kind: input, shape index: {}]   ;;  %s1481_s5 = inlined_call_operand.vmem [shape: bf16[128,5], index: 5, kind: input, shape index: {}]   ;;  %s1482_s6 = inlined_call_operand.vmem [shape: f32[1,5], index: 6, kind: input, shape index: {}]   ;;  %s1483_s7 = inlined_call_operand.vmem [shape: f32[16,5], index: 7, kind: output, shape index: {}]  }
   0x1 LB: > { %s212_s27 = sshll.u32 %s1477_s1, 4  ;;  %s1388_s28 = sadd.s32 4294967295, %s1334_s24   ;;  %s1334_s24 = sphi %s1379_s24, %s18_s24   ;;  %s213_s27 = int_to_ptr.hbm [resolvable:$true] %s212_s27 }
   0x2   : > { %p970_p0 = scmp.ge.s32.totalorder %s1334_s24, 1  ;;  %p201_p1 = scmp.lt.s32.totalorder %s1334_s24, 3 }
   0x3   : > { %p1274_p2 = scmp.eq.s32.totalorder %s1388_s28, 0  ;;  %s1336_s29 = smov [#allocation2]  }
   0x4   : > { %p202_p3 = pnand %p970_p0, %p201_p1  ;;  %s214_s30 = sshll.u32 %s1336_s29, 4  ;;  %s215_s30 = int_to_ptr.vmem [resolvable:$true] %s214_s30 }
   0x5   : > { %s1337_s8 = smov 64   ;;  %s1338_s9 = smov 4  }
   0x6   : > { %p1270_p4 = pneg %p202_p3  ;;  %253 = sbr.rel (%p202_p3) target bundleno = 737 (0x2e1), region = 48 }
   0x8   : > { %p1271_p5 = pnand %p1274_p2, %p1270_p4 }
   0xa   : > { %1273 = dma.hbm_to_vmem [thread:$0]  (!%p1271_p5), %s213_s27, 5248, %s215_s30, [#allocation3], %s1337_s8, %s1337_s8, %s1338_s9  }
   0xb   : > { %1329 = dma.done.wait (%p1274_p2), [#allocation3], 5248  }
   0xc   : > { %1331 = vsyncadd (%p1274_p2), [#allocation3], 4294962048  ;;  %v1215_v0 = vld [vmem:[#allocation2 + $0x38] sm:$0xff]  ;;  %v1214_v3 = vld [vmem:[#allocation2 + $0x30] sm:$0xff]  ;;  %p285_p6 = scmp.lt.s32.totalorder %s1388_s28, 1  ;;  %vm642_vm0 = vcmask 1044480  }
   0xd   : > { %v1223_v1 = vld [vmem:[#allocation2 + $0x78] sm:$0xff]  ;;  %646 = vmatpush.bf16.msra.mxu0 %v1215_v0  ;;  %v1222_v4 = vld [vmem:[#allocation2 + $0x70] sm:$0xff]  ;;  %v1213_v8 = vld [vmem:[#allocation2 + $0x28] sm:$0xff]  ;;  %vm638_vm1 = vcmask 80896   ;;  %vm890_vm2 = vcmask 39936  }
   0xe   : > { %v1231_v2 = vld [vmem:[#allocation2 + $0xb8] sm:$0xff]  ;;  %659 = vmatpush.bf16.msra.mxu1 %v1223_v1  ;;  %v1230_v6 = vld [vmem:[#allocation2 + $0xb0] sm:$0xff]  ;;  %v1221_v9 = vld [vmem:[#allocation2 + $0x68] sm:$0xff]  ;;  %s1485_s28 = smov (!%p285_p6, %s1388_s28), 1 }
   0xf   : > { %v1239_v5 = vld [vmem:[#allocation2 + $0xf8] sm:$0xff]  ;;  %672 = vmatpush.bf16.msra.mxu2 %v1231_v2  ;;  %v1238_v7 = vld [vmem:[#allocation2 + $0xf0] sm:$0xff]  ;;  %v1229_v10 = vld [vmem:[#allocation2 + $0xa8] sm:$0xff]  ;;  %s1265_s10 = smul.u32 48, %s1485_s28 }
  0x10   : > { %685 = vmatpush.bf16.msra.mxu3 %v1239_v5  ;;  %v1237_v11 = vld [vmem:[#allocation2 + $0xe8] sm:$0xff]  ;;  %v1212_v12 = vld [vmem:[#allocation2 + $0x20] sm:$0xff]  ;;  %v1211_v16 = vld [vmem:[#allocation2 + $0x18] sm:$0xff] }
  0x11   : > { %647 = vmatpush.bf16.msra.mxu0 %v1214_v3  ;;  %v1220_v13 = vld [vmem:[#allocation2 + $0x60] sm:$0xff]  ;;  %v1219_v17 = vld [vmem:[#allocation2 + $0x58] sm:$0xff]  ;;  %v1210_v20 = vld [vmem:[#allocation2 + $0x10] sm:$0xff]  ;;  %s1401_s13 = scalar_lea.vmem %s1476_s0, %s1265_s10  ;;  %s976_s10 = sshll.u32 %s1485_s28, 3 }
  0x12   : > { %660 = vmatpush.bf16.msra.mxu1 %v1222_v4  ;;  %v1228_v14 = vld [vmem:[#allocation2 + $0xa0] sm:$0xff]  ;;  %v1227_v18 = vld [vmem:[#allocation2 + $0x98] sm:$0xff]  ;;  %v1218_v21 = vld [vmem:[#allocation2 + $0x50] sm:$0xff] }
  0x13   : > { %673 = vmatpush.bf16.msra.mxu2 %v1230_v6  ;;  %v1236_v15 = vld [vmem:[#allocation2 + $0xe0] sm:$0xff]  ;;  %v1235_v19 = vld [vmem:[#allocation2 + $0xd8] sm:$0xff]  ;;  %v1226_v22 = vld [vmem:[#allocation2 + $0x90] sm:$0xff] }
  0x14   : > { %686 = vmatpush.bf16.msra.mxu3 %v1238_v7  ;;  %v1234_v23 = vld [vmem:[#allocation2 + $0xd0] sm:$0xff]  ;;  %v1209_v24 = vld [vmem:[#allocation2 + $0x8] sm:$0xff]  ;;  %v1139_v26 = vld [vmem:[#allocation2 + $0x140] sm:$0xf] }
  0x15   : > { %648 = vmatpush.bf16.msra.mxu0 %v1213_v8  ;;  %v1217_v25 = vld [vmem:[#allocation2 + $0x48] sm:$0xff]  ;;  %v1248_v27 = vld [vmem:[#allocation2 + $0x140] sm:$0x10]  ;;  %v1247_v35 = vld [vmem:[#allocation2 + $0x138] sm:$0xff] }
  0x16   : > { %661 = vmatpush.bf16.msra.mxu1 %v1221_v9  ;;  %v1225_v28 = vld [vmem:[#allocation2 + $0x88] sm:$0xff]  ;;  %v1208_v30 = vld [vmem:[#allocation2] sm:$0xff]  ;;  %v1140_v31 = vor.u32 %v1248_v27, %v1139_v26  ;;  %v297_v37 = vld [vmem:[%s1401_s13 + $0x10] sm:$0xff] }
  0x17   : > { %674 = vmatpush.bf16.msra.mxu2 %v1229_v10  ;;  %v1233_v29 = vld [vmem:[#allocation2 + $0xc8] sm:$0xff]  ;;  %v1216_v32 = vld [vmem:[#allocation2 + $0x40] sm:$0xff]  ;;  %v298_v39 = vld [vmem:[%s1401_s13 + $0x18] sm:$0xff]  ;;  %v303_v43 = vpack.c.bf16 %v297_v37, %v297_v37 }
  0x18   : > { %687 = vmatpush.bf16.msra.mxu3 %v1237_v11  ;;  %v295_v33 = vld [vmem:[%s1401_s13] sm:$0xff]  ;;  %v296_v34 = vld [vmem:[%s1401_s13 + $0x8] sm:$0xff]  ;;  %v644_v42 = vsel %vm642_vm0, %v1140_v31, 0  ;;  %v1246_v44 = vld [vmem:[#allocation2 + $0x130] sm:$0xff]  ;;  %v304_v45 = vpack.c.bf16 %v298_v39, %v298_v39 }
  0x19   : > { %649 = vmatpush.bf16.msra.mxu0 %v1212_v12  ;;  %v1224_v36 = vld [vmem:[#allocation2 + $0x80] sm:$0xff]  ;;  %v301_v40 = vpack.c.bf16 %v295_v33, %v295_v33  ;;  %v302_v41 = vpack.c.bf16 %v296_v34, %v296_v34  ;;  %v1245_v46 = vld [vmem:[#allocation2 + $0x128] sm:$0xff]  ;;  %v1243_v49 = vld [vmem:[#allocation2 + $0x118] sm:$0xff] }
  0x1a   : > { %662 = vmatpush.bf16.msra.mxu1 %v1220_v13  ;;  %v1232_v38 = vld [vmem:[#allocation2 + $0xc0] sm:$0xff]  ;;  %v300_v48 = vld [vmem:[%s1401_s13 + $0x28] sm:$0xff]  ;;  %v1242_v51 = vld [vmem:[#allocation2 + $0x110] sm:$0xff] }
  0x1b   : > { %675 = vmatpush.bf16.msra.mxu2 %v1228_v14  ;;  %v1244_v47 = vld [vmem:[#allocation2 + $0x120] sm:$0xff]  ;;  %v306_v50 = vpack.c.bf16 %v300_v48, %v300_v48  ;;  %v1241_v52 = vld [vmem:[#allocation2 + $0x108] sm:$0xff]  ;;  %v1256_v56 = vld [vmem:[%s1479_s3 + $0x38] sm:$0xff] }
  0x1c   : > { %688 = vmatpush.bf16.msra.mxu3 %v1236_v15  ;;  %v1240_v53 = vld [vmem:[#allocation2 + $0x100] sm:$0xff]  ;;  %v1255_v57 = vld [vmem:[%s1479_s3 + $0x30] sm:$0xff]  ;;  %v1254_v58 = vld [vmem:[%s1479_s3 + $0x28] sm:$0xff] }
  0x1d   : > { %650 = vmatpush.bf16.msra.mxu0 %v1211_v16  ;;  %v299_v54 = vld [vmem:[%s1401_s13 + $0x20] sm:$0xff]  ;;  %v1252_v60 = vld [vmem:[%s1479_s3 + $0x18] sm:$0xff]  ;;  %v1251_v61 = vld [vmem:[%s1479_s3 + $0x10] sm:$0xff]  ;;  %s293_s13 = scalar_lea.vmem %s1483_s7, %s976_s10 }
  0x1e   : > { %663 = vmatpush.bf16.msra.mxu1 %v1219_v17  ;;  %v305_v55 = vpack.c.bf16 %v299_v54, %v299_v54  ;;  %v1253_v59 = vld [vmem:[%s1479_s3 + $0x20] sm:$0xff]  ;;  %v1250_v62 = vld [vmem:[%s1479_s3 + $0x8] sm:$0xff]  ;;  %v1264_v2 = vld [vmem:[%s1481_s5 + $0x38] sm:$0xff] }
  0x1f   : > { %676 = vmatpush.bf16.msra.mxu2 %v1227_v18  ;;  %v1249_v1 = vld [vmem:[%s1479_s3] sm:$0xff]  ;;  %v1263_v6 = vld [vmem:[%s1481_s5 + $0x30] sm:$0xff]  ;;  %v1262_v9 = vld [vmem:[%s1481_s5 + $0x28] sm:$0xff] }
  0x20   : > { %689 = vmatpush.bf16.msra.mxu3 %v1235_v19  ;;  %v1287_v8 = vld [vmem:[%s1478_s2] ss:$0 sm:$0xff]  ;;  %v1260_v16 = vld [vmem:[%s1481_s5 + $0x18] sm:$0xff]  ;;  %v1259_v19 = vld [vmem:[%s1481_s5 + $0x10] sm:$0xff] }
  0x21   : > { %651 = vmatpush.bf16.msra.mxu0 %v1210_v20  ;;  %v1261_v13 = vld [vmem:[%s1481_s5 + $0x20] sm:$0xff]  ;;  %v1258_v27 = vld [vmem:[%s1481_s5 + $0x8] sm:$0xff] }
  0x22   : > { %664 = vmatpush.bf16.msra.mxu1 %v1218_v21 }
  0x23   : > { %677 = vmatpush.bf16.msra.mxu2 %v1226_v22 }
  0x24   : > { %690 = vmatpush.bf16.msra.mxu3 %v1234_v23 }
  0x25   : > { %652 = vmatpush.bf16.msra.mxu0 %v1209_v24 }
  0x26   : > { %665 = vmatpush.bf16.msra.mxu1 %v1217_v25 }
  0x27   : > { %678 = vmatpush.bf16.msra.mxu2 %v1225_v28  ;;  %v1257_v28 = vld [vmem:[%s1481_s5] sm:$0xff] }
  0x28   : > { %691 = vmatpush.bf16.msra.mxu3 %v1233_v29  ;;  %v1288_v29 = vld [vmem:[%s1480_s4] ss:$0 sm:$0xff] }
  0x29   : > { %653 = vmatpush.bf16.msra.mxu0 %v1208_v30 }
  0x2a   : > { %666 = vmatpush.bf16.msra.mxu1 %v1216_v32 }
  0x2b   : > { %679 = vmatpush.bf16.msra.mxu2 %v1224_v36 }
  0x2c   : > { %692 = vmatpush.bf16.msra.mxu3 %v1232_v38  ;;  %654 = vmatmul.bf16.vlgmr.msra.gmra.mxu0 %v301_v40 }
  0x2d   : > { %698 = vmatpush.bf16.msrb.mxu0 %v1247_v35  ;;  %667 = vmatmul.bf16.vlgmr.msra.gmra.mxu1 %v302_v41  ;;  %v1289_v35 = vld [vmem:[%s1482_s6] ss:$0 sm:$0xff] }
  0x2e   : > { %718 = vmatpush.bf16.msrb.mxu1 %v644_v42  ;;  %680 = vmatmul.bf16.vlgmr.msra.gmra.mxu2 %v303_v43 }
  0x2f   : > { %693 = vmatmul.bf16.vlgmr.msra.gmra.mxu3 %v304_v45  ;;  %794 = vmatpush.bf16.msrb.mxu2 %v1256_v56 }
  0x30   : > { %877 = vmatpush.bf16.msrb.mxu3 %v1264_v2 }
  0x31   : > { %699 = vmatpush.bf16.msrb.mxu0 %v1246_v44 }
  0x33   : > { %795 = vmatpush.bf16.msrb.mxu2 %v1255_v57 }
  0x34   : > { %878 = vmatpush.bf16.msrb.mxu3 %v1263_v6 }
  0x35   : > { %700 = vmatpush.bf16.msrb.mxu0 %v1245_v46 }
  0x37   : > { %796 = vmatpush.bf16.msrb.mxu2 %v1254_v58 }
  0x38   : > { %879 = vmatpush.bf16.msrb.mxu3 %v1262_v9 }
  0x39   : > { %701 = vmatpush.bf16.msrb.mxu0 %v1244_v47 }
  0x3b   : > { %797 = vmatpush.bf16.msrb.mxu2 %v1253_v59 }
  0x3c   : > { %880 = vmatpush.bf16.msrb.mxu3 %v1261_v13 }
  0x3d   : > { %702 = vmatpush.bf16.msrb.mxu0 %v1243_v49  ;;  %1141 = vmatmul.msk.bf16.vlgmr.msrb.gmra.mxu1 %vm638_vm1, %v306_v50 }
  0x3f   : > { %798 = vmatpush.bf16.msrb.mxu2 %v1252_v60 }
  0x40   : > { %881 = vmatpush.bf16.msrb.mxu3 %v1260_v16 }
  0x41   : > { %703 = vmatpush.bf16.msrb.mxu0 %v1242_v51 }
  0x43   : > { %799 = vmatpush.bf16.msrb.mxu2 %v1251_v61 }
  0x44   : > { %882 = vmatpush.bf16.msrb.mxu3 %v1259_v19 }
  0x45   : > { %704 = vmatpush.bf16.msrb.mxu0 %v1241_v52 }
  0x47   : > { %800 = vmatpush.bf16.msrb.mxu2 %v1250_v62 }
  0x48   : > { %883 = vmatpush.bf16.msrb.mxu3 %v1258_v27 }
  0x49   : > { %705 = vmatpush.bf16.msrb.mxu0 %v1240_v53 }
  0x4b   : > { %801 = vmatpush.bf16.msrb.mxu2 %v1249_v1 }
  0x4c   : > { %706 = vmatmul.bf16.vlgmr.msrb.gmra.mxu0 %v305_v55  ;;  %884 = vmatpush.bf16.msrb.mxu3 %v1257_v28 }
  0xa9   : > { %v655_v63 = vpop.f32.mrf.mxu0 }
  0xaa   : > { %v668_v0 = vpop.f32.mrf.mxu1  ;;  %v656_v11 = vadd.f32 %v1287_v8, %v655_v63 }
  0xac   : > { %v669_v15 = vadd.f32 %v668_v0, %v656_v11 }
  0xb1   : > { %v681_v3 = vpop.f32.mrf.mxu2  ;;  %v657_v4 = vpop.f32.mrf.mxu0 }
  0xb2   : > { %v670_v5 = vpop.f32.mrf.mxu1  ;;  %v694_v7 = vpop.f32.mrf.mxu3  ;;  %v682_v17 = vadd.f32 %v681_v3, %v669_v15 }
  0xb4   : > { %v695_v20 = vadd.f32 %v694_v7, %v682_v17 }
  0xb9   : > { %v683_v10 = vpop.f32.mrf.mxu2 }
  0xba   : > { %v720_v12 = vpop.f32.mrf.mxu1  ;;  %v696_v14 = vpop.f32.mrf.mxu3 }
  0xc2   : > { %v722_v18 = vpop.f32.mrf.mxu1 }
  0xc9   : > { %v707_v21 = vpop.f32.mrf.mxu0 }
  0xca   : > { %v708_v22 = vadd.f32 %v707_v21, %v695_v20 }
  0xcc   : > { %v721_v23 = vadd.f32 %v720_v12, %v708_v22 }
  0xce   : > { %v724_v24 = vmax.f32 %v721_v23, 0.0 }
  0xd0   : > { %v725_v25 = vpack.c.bf16 %v724_v24, %v724_v24 }
  0xd1   : > { %v709_v26 = vpop.f32.mrf.mxu0 }
  0xd2   : > { %802 = vmatmul.bf16.vlgmr.msrb.gmra.mxu2 %v725_v25 }
 0x155   : > { %v803_v30 = vpop.f32.mrf.mxu2 }
 0x156   : > { %v804_v31 = vadd.f32 %v1288_v29, %v803_v30 }
 0x158   : > { %v807_v32 = vmax.f32 %v804_v31, 0.0 }
 0x15a   : > { %v808_v33 = vpack.c.bf16 %v807_v32, %v807_v32 }
 0x15c   : > { %885 = vmatmul.bf16.vlgmr.msrb.gmra.mxu3 %v808_v33 }
 0x15d   : > { %v805_v34 = vpop.f32.mrf.mxu2 }
 0x1df   : > { %v886_v36 = vpop.f32.mrf.mxu3 }
 0x1e0   : > { %v887_v37 = vadd.f32 %v1289_v35, %v886_v36 }
 0x1e2   : > { %v891_v38 = vsel %vm890_vm2, %v887_v37, -inf }
 0x1e3   : > { %892 = vmax.xlane.f32.xlu0 %v891_v38 }
 0x1e7   : > { %v888_v39 = vpop.f32.mrf.mxu3 }
 0x256   : > { %v893_v40 = vpop.xlane.xlu0 %892 }
 0x257   : > { %v894_v41 = vsub.f32 %v887_v37, %v893_v40 }
 0x259   : > { %v895_v42 = vmul.f32 1.442695, %v894_v41 }
 0x25b   : > { %1290 = vpow2.f32 %v895_v42 }
 0x261   : > { %v1291_v43 = vpop.eup %1290 }
 0x262   : > { %v897_v44 = vsel %vm890_vm2, %v1291_v43, 0.0 }
 0x263   : > { %898 = vadd.xlane.f32.xlu0 %v897_v44 }
 0x2d6   : > { %v899_v45 = vpop.xlane.xlu0 %898 }
 0x2d7   : > { %1292 = vrcp.f32 %v899_v45 }
 0x2dd   : > { %v1293_v46 = vpop.eup %1292 }
 0x2de   : > { %v901_v47 = vmul.f32 %v1293_v46, %v1291_v43 }
 0x2e0   : > { %902 = vst.msk [vmem:[%s293_s13] sm:$0xff] %vm890_vm2, %v901_v47 }
 0x2e1 PF: > { %s18_s24 = sadd.s32 1, %s1334_s24  }
 0x2e2   : > { %p15_p7 = scmp.ge.s32.totalorder %s18_s24, 4  }
 0x2e4   :  { %17 = sbr.rel (!%p15_p7) target bundleno = 1 (0x1), region = 83 }
 0x2e9   :  { %922 = vsyncpa [#allocation3], 1 }
 0x2ea   :  { %924 = vsyncpa [#allocation3 + $0x1], 1 }

</bundles_post_ra>
